<compile_context>
chip_gen: v6e
topology: v6e:2x2x1
jax: 0.10.0
libtpu: 0.0.40
codegen_flags: <defaults>
</compile_context>

<pallas_src>
import functools

import jax
import jax.numpy as jnp
from jax.experimental import pallas as pl
from jax.experimental.pallas import tpu as pltpu

# ---------------- hyper-params (match the PyTorch module defaults) -----------
ALPHA = 0.1            # TauRLayer alpha
BETA = 0.1             # TauRLayer beta
EPSILON = 1e-6         # TauRLayer epsilon
MIN_DENOM = 1e-5       # TauRLayer min_denominator
LN_EPS = 1e-5          # nn.LayerNorm default eps


def _ceil128(n):
    return ((n + 127) // 128) * 128


# ---------------- fused whole-network kernel ----------------------------------
def _make_fused_kernel(n_layers, hidden_true, hidden_pad):
    Hp = hidden_pad
    inv_h = 1.0 / float(hidden_true)

    def kernel(x_ref, w1f_ref, w1r_ref, wpr_ref, vec_ref, ow_ref, ob_ref, o_ref):
        cur = x_ref[...]                                      # (TB, Din) f32, VMEM-resident
        for i in range(n_layers):                             # static unroll over layers
            w1 = w1f_ref[...] if i == 0 else w1r_ref[i - 1]   # (Din|Hp, Hp)
            vec = vec_ref[i]                                  # (5, Hp)
            b1, gamma, beta = vec[0:1, :], vec[1:2, :], vec[2:3, :]
            bpr_p, bpr_r = vec[3:4, :], vec[4:5, :]

            # Linear(cur_dim, H): padded weight columns / bias are zero, so the
            # padded lanes of h are exactly 0.
            h = jnp.dot(cur, w1, preferred_element_type=jnp.float32) + b1

            # LayerNorm(H): one-pass stats (E[x^2] - E[x]^2).  Sums over all Hp
            # lanes equal sums over the true H lanes (padding is zero); divide
            # by the true H.  gamma/beta are zero in the padded lanes, so the
            # padded lanes of the normalized output stay 0.
            mean = jnp.sum(h, axis=-1, keepdims=True) * inv_h
            msq = jnp.sum(h * h, axis=-1, keepdims=True) * inv_h
            var = msq - mean * mean
            h = (h - mean) * jax.lax.rsqrt(var + LN_EPS) * gamma + beta
            h = jnp.maximum(h, 0.0)                           # ReLU

            # TauRLayer: single (Hp, 2*Hp) matmul; progress|risk split at the
            # 128-lane-aligned Hp boundary (no intra-vreg slicing).
            pr = jnp.dot(h, wpr_ref[i], preferred_element_type=jnp.float32)
            progress = jnp.tanh(pr[:, :Hp] + bpr_p)
            risk = jnp.maximum(pr[:, Hp:] + bpr_r, 0.0)
            num = progress + ALPHA
            den = jnp.maximum(risk + BETA + EPSILON, MIN_DENOM)
            # EUP approx reciprocal (free bundle slot) + one Newton step gives
            # ~f32 accuracy.  clamp(tanh, -10, 10) from the module is a no-op.
            r = pl.reciprocal(den, approx=True)
            r = r * (2.0 - den * r)
            tau = jnp.tanh(num * r)

            # Outer ReLU applied by EvolvingNetwork.forward after each block.
            # (Padded lanes of `cur` carry relu(tanh(alpha/clamp(...))) != 0,
            #  but every downstream weight row beyond H is zero-padded, so they
            #  never contribute to any matmul.)
            cur = jnp.maximum(tau, 0.0)

        # Final Linear(H, output_dim) into a lane-dense 128-padded f32 slab.
        o_ref[...] = (jnp.dot(cur, ow_ref[...],
                              preferred_element_type=jnp.float32) + ob_ref[...])

    return kernel


# ---------------- pallas_call wrapper ------------------------------------------
def _const_spec(shape):
    nd = len(shape)
    return pl.BlockSpec(shape, lambda b: (0,) * nd,
                        memory_space=pltpu.MemorySpace.VMEM)


@functools.partial(jax.jit, static_argnames=("hidden_dim", "output_dim"))
def evolving_network_forward(x, packed, *, hidden_dim, output_dim):
    x = x.astype(jnp.float32)
    B, Din = x.shape
    n_layers = packed["wpr"].shape[0]
    Hp = packed["w1_first"].shape[1]
    P = packed["out_w"].shape[1]

    # Batch tiling: ~B/2 rows per tile (>=2 grid steps when B >= 16 -> shards
    # across v7x's two TensorCores; neutral on v5e/v6e), up to 512 rows, capped
    # so f32 activations (~2*Hp wide) stay within a ~8 MiB budget.
    if B <= 8:
        TB = 8
    else:
        TB = min(512, ((pl.cdiv(B, 2) + 7) // 8) * 8)
    tb_cap = max(8, ((8 << 20) // (2 * Hp * 4)) // 8 * 8)
    TB = max(8, min(TB, tb_cap))
    Bp = pl.cdiv(B, TB) * TB
    if Bp != B:                                    # pad batch; sliced off below
        x = jnp.zeros((Bp, Din), jnp.float32).at[:B].set(x)
    grid = (Bp // TB,)

    weights = (packed["w1_first"], packed["w1_rest"], packed["wpr"],
               packed["vec"], packed["out_w"], packed["out_b"])
    flat_args = (x,) + weights

    in_specs = [pl.BlockSpec((TB, Din), lambda b: (b, 0),
                             memory_space=pltpu.MemorySpace.VMEM)]
    # Grid-invariant weight specs (pl.Buffered(1) would halve their VMEM; see header).
    in_specs += [_const_spec(w.shape) for w in weights]
    out_spec = pl.BlockSpec((TB, P), lambda b: (b, 0),
                            memory_space=pltpu.MemorySpace.VMEM)

    # Explicit scoped-VMEM budget: weights x2 (double-buffered) + IO tiles x2
    # + activation headroom, clamped to [16 MiB, 64 MiB] (v7x physical VMEM).
    weight_bytes = sum(int(w.size) * w.dtype.itemsize for w in weights)
    io_bytes = (TB * Din + TB * P) * 4
    act_bytes = TB * 2 * Hp * 4
    vmem_limit = int(2 * weight_bytes + 2 * io_bytes + 10 * act_bytes + (4 << 20))
    vmem_limit = int(min(max(vmem_limit, 16 << 20), 64 << 20))

    # Advisory cost estimate (padded dims).
    flops = (2 * Bp * Din * Hp + (n_layers - 1) * 2 * Bp * Hp * Hp
             + n_layers * 2 * Bp * Hp * (2 * Hp) + 2 * Bp * Hp * P)
    transcendentals = n_layers * Bp * (3 * Hp + 1)
    bytes_accessed = sum(int(a.size) * a.dtype.itemsize for a in flat_args) + Bp * P * 4

    out_padded = pl.pallas_call(
        _make_fused_kernel(n_layers, hidden_dim, Hp),
        out_shape=jax.ShapeDtypeStruct((Bp, P), jnp.float32),
        grid=grid,
        in_specs=in_specs,
        out_specs=out_spec,
        compiler_params=pltpu.CompilerParams(
            dimension_semantics=("parallel",),
            vmem_limit_bytes=vmem_limit),
        cost_estimate=pl.CostEstimate(flops=int(flops),
                                      transcendentals=int(transcendentals),
                                      bytes_accessed=int(bytes_accessed)),
    )(*flat_args)
    # Keep output f32 (bf16 slab would drift past tolerance vs the f32 module);
    # fold this slice into the consumer if the output feeds another fused op.
    return out_padded[:B, :output_dim]


# ---------------- parameter init (deterministic, synthetic, PyTorch-faithful) --
def _uniform(key, shape, scale):
    return jax.random.uniform(key, shape, jnp.float32, -scale, scale)


def init_params(key, input_dim, hidden_dim, output_dim, n_layers):
    """Unpadded f32 parameters mirroring the module: nn.Linear default
    U(+-1/sqrt(fan_in)) weight+bias; LayerNorm gamma=1, beta=0; TauRLayer
    xavier_uniform(gain=0.1) weights with zero biases.  Weights stored (in, out)."""
    layers = []
    cur = input_dim
    for _ in range(n_layers):
        key, k1, kb1, kp, kr = jax.random.split(key, 5)
        s1 = 1.0 / (cur ** 0.5)
        st = 0.1 * (6.0 / (2 * hidden_dim)) ** 0.5
        layers.append({
            "w1": _uniform(k1, (cur, hidden_dim), s1),
            "b1": _uniform(kb1, (hidden_dim,), s1),
            "gamma": jnp.ones((hidden_dim,), jnp.float32),
            "beta": jnp.zeros((hidden_dim,), jnp.float32),
            "wp": _uniform(kp, (hidden_dim, hidden_dim), st),
            "bp": jnp.zeros((hidden_dim,), jnp.float32),
            "wr": _uniform(kr, (hidden_dim, hidden_dim), st),
            "br": jnp.zeros((hidden_dim,), jnp.float32),
        })
        cur = hidden_dim
    key, ko, kob = jax.random.split(key, 3)
    so = 1.0 / (cur ** 0.5)
    return {"layers": layers,
            "out_w": _uniform(ko, (cur, output_dim), so),
            "out_b": _uniform(kob, (output_dim,), so)}


def pack_params(params):
    """Pack into the lane-dense (H padded to 128), layer-stacked kernel layout."""
    layers = params["layers"]
    n_layers = len(layers)
    din = layers[0]["w1"].shape[0]
    h = layers[0]["w1"].shape[1]
    hp = _ceil128(h)
    out_dim = params["out_w"].shape[1]
    p = _ceil128(out_dim)

    def pad2(a, rows, cols):
        return jnp.zeros((rows, cols), jnp.float32).at[:a.shape[0], :a.shape[1]].set(a)

    def padv(v):
        return jnp.zeros((hp,), jnp.float32).at[:v.shape[0]].set(v)

    w1_first = pad2(layers[0]["w1"], din, hp)                       # (Din, Hp)
    if n_layers > 1:
        w1_rest = jnp.stack([pad2(lp["w1"], hp, hp) for lp in layers[1:]])
    else:  # dummy, never read when n_layers == 1
        w1_rest = jnp.zeros((1, hp, hp), jnp.float32)
    wpr = jnp.stack([jnp.concatenate([pad2(lp["wp"], hp, hp),
                                      pad2(lp["wr"], hp, hp)], axis=1)
                     for lp in layers])                             # (L, Hp, 2*Hp)
    vec = jnp.stack([jnp.stack([padv(lp["b1"]), padv(lp["gamma"]),
                                padv(lp["beta"]), padv(lp["bp"]), padv(lp["br"])])
                     for lp in layers])                             # (L, 5, Hp)
    out_w = pad2(params["out_w"], hp, p)                            # (Hp, P)
    out_b = jnp.zeros((1, p), jnp.float32).at[0, :out_dim].set(params["out_b"])
    return {"w1_first": w1_first, "w1_rest": w1_rest, "wpr": wpr,
            "vec": vec, "out_w": out_w, "out_b": out_b}


# ---------------- pure-JAX f32 reference (PyTorch-faithful) --------------------
def _dot(a, b):
    return jnp.dot(a, b, precision=jax.lax.Precision.HIGHEST)


def _reference_forward(x, params):
    cur = x.astype(jnp.float32)
    for p in params["layers"]:
        h = _dot(cur, p["w1"]) + p["b1"]
        mean = jnp.mean(h, axis=-1, keepdims=True)
        var = jnp.mean((h - mean) ** 2, axis=-1, keepdims=True)
        h = (h - mean) / jnp.sqrt(var + LN_EPS) * p["gamma"] + p["beta"]
        h = jnp.maximum(h, 0.0)
        prog = jnp.tanh(_dot(h, p["wp"]) + p["bp"])
        risk = jnp.maximum(_dot(h, p["wr"]) + p["br"], 0.0)
        tau = jnp.tanh((prog + ALPHA) /
                       jnp.maximum(risk + BETA + EPSILON, MIN_DENOM))
        tau = jnp.clip(tau, -10.0, 10.0)          # module's (no-op) clamp
        cur = jnp.maximum(tau, 0.0)
    return _dot(cur, params["out_w"]) + params["out_b"]


if __name__ == "__main__":
    INPUT_DIM, HIDDEN_DIM, OUTPUT_DIM = 16, 32, 8
    INITIAL_LAYERS = 2
    BATCH = 8

    key = jax.random.PRNGKey(0)
    kx, kp = jax.random.split(key)
    x = jax.random.normal(kx, (BATCH, INPUT_DIM), jnp.float32)
    params = init_params(kp, INPUT_DIM, HIDDEN_DIM, OUTPUT_DIM, INITIAL_LAYERS)
    packed = pack_params(params)

    out = evolving_network_forward(x, packed,
                                   hidden_dim=HIDDEN_DIM, output_dim=OUTPUT_DIM)
    out = jax.block_until_ready(out)

    ref = _reference_forward(x, params)
    assert out.shape == (BATCH, OUTPUT_DIM)
    assert jnp.allclose(out, ref, atol=2e-4, rtol=2e-4), \
        float(jnp.max(jnp.abs(out - ref)))

    # TODO(synk): evolve()/performance_history (dynamic layer growth) is host-side
    # control logic; each evolved architecture re-traces into its own fused kernel.
    print("KERNEL_OK")
</pallas_src>

<mosaic_0001>
module attributes {stable_mosaic.version = 11 : i64} {
  func.func @kernel(%arg0: i32, %arg1: memref<8x16xf32, #tpu.memory_space<vmem>>, %arg2: memref<16x128xf32, #tpu.memory_space<vmem>>, %arg3: memref<1x128x128xf32, #tpu.memory_space<vmem>>, %arg4: memref<2x128x256xf32, #tpu.memory_space<vmem>>, %arg5: memref<2x5x128xf32, #tpu.memory_space<vmem>>, %arg6: memref<128x128xf32, #tpu.memory_space<vmem>>, %arg7: memref<1x128xf32, #tpu.memory_space<vmem>>, %arg8: memref<8x128xf32, #tpu.memory_space<vmem>>) attributes {dimension_semantics = [#tpu.dimension_semantics<parallel>], iteration_bounds = array<i64: 1>, scalar_prefetch = 0 : i64, scratch_operands = 0 : i64, tpu.core_type = #tpu.core_type<tc>, window_params = [{transform_indices = @transform_0, window_bounds = array<i64: 8, 16>}, {pipeline_mode = #tpu.pipeline_mode<synchronous>, transform_indices = @transform_1, window_bounds = array<i64: 16, 128>}, {pipeline_mode = #tpu.pipeline_mode<synchronous>, transform_indices = @transform_2, window_bounds = array<i64: 1, 128, 128>}, {pipeline_mode = #tpu.pipeline_mode<synchronous>, transform_indices = @transform_3, window_bounds = array<i64: 2, 128, 256>}, {pipeline_mode = #tpu.pipeline_mode<synchronous>, transform_indices = @transform_4, window_bounds = array<i64: 2, 5, 128>}, {pipeline_mode = #tpu.pipeline_mode<synchronous>, transform_indices = @transform_5, window_bounds = array<i64: 128, 128>}, {pipeline_mode = #tpu.pipeline_mode<synchronous>, transform_indices = @transform_6, window_bounds = array<i64: 1, 128>}, {transform_indices = @transform_7, window_bounds = array<i64: 8, 128>}]} {
    %c0 = arith.constant 0 : index
    %c0_0 = arith.constant 0 : index
    %0 = vector.load %arg1[%c0, %c0_0] : memref<8x16xf32, #tpu.memory_space<vmem>>, vector<8x16xf32>
    %c0_1 = arith.constant 0 : index
    %c0_2 = arith.constant 0 : index
    %1 = vector.load %arg2[%c0_1, %c0_2] : memref<16x128xf32, #tpu.memory_space<vmem>>, vector<16x128xf32>
    %c0_3 = arith.constant 0 : index
    %c0_4 = arith.constant 0 : index
    %c0_5 = arith.constant 0 : index
    %2 = vector.load %arg5[%c0_3, %c0_4, %c0_5] : memref<2x5x128xf32, #tpu.memory_space<vmem>>, vector<1x5x128xf32>
    %3 = vector.shape_cast %2 : vector<1x5x128xf32> to vector<5x128xf32>
    %4 = vector.extract_strided_slice %3 {offsets = [0, 0], sizes = [1, 128], strides = [1, 1]} : vector<5x128xf32> to vector<1x128xf32>
    %5 = vector.extract_strided_slice %3 {offsets = [1, 0], sizes = [1, 128], strides = [1, 1]} : vector<5x128xf32> to vector<1x128xf32>
    %6 = vector.extract_strided_slice %3 {offsets = [2, 0], sizes = [1, 128], strides = [1, 1]} : vector<5x128xf32> to vector<1x128xf32>
    %7 = vector.extract_strided_slice %3 {offsets = [3, 0], sizes = [1, 128], strides = [1, 1]} : vector<5x128xf32> to vector<1x128xf32>
    %8 = vector.extract_strided_slice %3 {offsets = [4, 0], sizes = [1, 128], strides = [1, 1]} : vector<5x128xf32> to vector<1x128xf32>
    %cst = arith.constant dense<0.000000e+00> : vector<8x128xf32>
    %9 = tpu.matmul %0, %1, %cst {dimension_numbers = #tpu.dot_dimension_numbers<[1], [0], [0], [1], [0, 0, 1, 1], [], []>} : vector<8x16xf32>, vector<16x128xf32>, vector<8x128xf32> -> vector<8x128xf32>
    %10 = vector.broadcast %4 : vector<1x128xf32> to vector<8x128xf32>
    %11 = arith.addf %9, %10 : vector<8x128xf32>
    %cst_6 = arith.constant dense<0.000000e+00> : vector<8xf32>
    %12 = vector.multi_reduction <add>, %11, %cst_6 [1] : vector<8x128xf32> to vector<8xf32>
    %13 = vector.shape_cast %12 : vector<8xf32> to vector<8x1xf32>
    %cst_7 = arith.constant 3.125000e-02 : f32
    %14 = vector.broadcast %cst_7 : f32 to vector<8x1xf32>
    %15 = arith.mulf %13, %14 : vector<8x1xf32>
    %16 = arith.mulf %11, %11 : vector<8x128xf32>
    %cst_8 = arith.constant dense<0.000000e+00> : vector<8xf32>
    %17 = vector.multi_reduction <add>, %16, %cst_8 [1] : vector<8x128xf32> to vector<8xf32>
    %18 = vector.shape_cast %17 : vector<8xf32> to vector<8x1xf32>
    %cst_9 = arith.constant 3.125000e-02 : f32
    %19 = vector.broadcast %cst_9 : f32 to vector<8x1xf32>
    %20 = arith.mulf %18, %19 : vector<8x1xf32>
    %21 = arith.mulf %15, %15 : vector<8x1xf32>
    %22 = arith.subf %20, %21 : vector<8x1xf32>
    %23 = vector.broadcast %15 : vector<8x1xf32> to vector<8x128xf32>
    %24 = arith.subf %11, %23 : vector<8x128xf32>
    %cst_10 = arith.constant 9.99999974E-6 : f32
    %25 = vector.broadcast %cst_10 : f32 to vector<8x1xf32>
    %26 = arith.addf %22, %25 : vector<8x1xf32>
    %27 = math.rsqrt %26 : vector<8x1xf32>
    %28 = vector.broadcast %27 : vector<8x1xf32> to vector<8x128xf32>
    %29 = arith.mulf %24, %28 : vector<8x128xf32>
    %30 = vector.broadcast %5 : vector<1x128xf32> to vector<8x128xf32>
    %31 = arith.mulf %29, %30 : vector<8x128xf32>
    %32 = vector.broadcast %6 : vector<1x128xf32> to vector<8x128xf32>
    %33 = arith.addf %31, %32 : vector<8x128xf32>
    %cst_11 = arith.constant 0.000000e+00 : f32
    %34 = vector.broadcast %cst_11 : f32 to vector<8x128xf32>
    %35 = arith.maximumf %33, %34 : vector<8x128xf32>
    %c0_12 = arith.constant 0 : index
    %c0_13 = arith.constant 0 : index
    %c0_14 = arith.constant 0 : index
    %36 = vector.load %arg4[%c0_12, %c0_13, %c0_14] : memref<2x128x256xf32, #tpu.memory_space<vmem>>, vector<1x128x256xf32>
    %37 = vector.shape_cast %36 : vector<1x128x256xf32> to vector<128x256xf32>
    %cst_15 = arith.constant dense<0.000000e+00> : vector<8x256xf32>
    %38 = tpu.matmul %35, %37, %cst_15 {dimension_numbers = #tpu.dot_dimension_numbers<[1], [0], [0], [1], [0, 0, 1, 1], [], []>} : vector<8x128xf32>, vector<128x256xf32>, vector<8x256xf32> -> vector<8x256xf32>
    %39 = vector.extract_strided_slice %38 {offsets = [0, 0], sizes = [8, 128], strides = [1, 1]} : vector<8x256xf32> to vector<8x128xf32>
    %40 = vector.broadcast %7 : vector<1x128xf32> to vector<8x128xf32>
    %41 = arith.addf %39, %40 : vector<8x128xf32>
    %42 = math.tanh %41 : vector<8x128xf32>
    %43 = vector.extract_strided_slice %38 {offsets = [0, 128], sizes = [8, 128], strides = [1, 1]} : vector<8x256xf32> to vector<8x128xf32>
    %44 = vector.broadcast %8 : vector<1x128xf32> to vector<8x128xf32>
    %45 = arith.addf %43, %44 : vector<8x128xf32>
    %cst_16 = arith.constant 0.000000e+00 : f32
    %46 = vector.broadcast %cst_16 : f32 to vector<8x128xf32>
    %47 = arith.maximumf %45, %46 : vector<8x128xf32>
    %cst_17 = arith.constant 1.000000e-01 : f32
    %48 = vector.broadcast %cst_17 : f32 to vector<8x128xf32>
    %49 = arith.addf %42, %48 : vector<8x128xf32>
    %cst_18 = arith.constant 1.000000e-01 : f32
    %50 = vector.broadcast %cst_18 : f32 to vector<8x128xf32>
    %51 = arith.addf %47, %50 : vector<8x128xf32>
    %cst_19 = arith.constant 9.99999997E-7 : f32
    %52 = vector.broadcast %cst_19 : f32 to vector<8x128xf32>
    %53 = arith.addf %51, %52 : vector<8x128xf32>
    %cst_20 = arith.constant 9.99999974E-6 : f32
    %54 = vector.broadcast %cst_20 : f32 to vector<8x128xf32>
    %55 = arith.maximumf %53, %54 : vector<8x128xf32>
    %56 = tpu.reciprocal %55 {approx = true} : vector<8x128xf32> -> vector<8x128xf32>
    %57 = arith.mulf %55, %56 : vector<8x128xf32>
    %cst_21 = arith.constant 2.000000e+00 : f32
    %58 = vector.broadcast %cst_21 : f32 to vector<8x128xf32>
    %59 = arith.subf %58, %57 : vector<8x128xf32>
    %60 = arith.mulf %56, %59 : vector<8x128xf32>
    %61 = arith.mulf %49, %60 : vector<8x128xf32>
    %62 = math.tanh %61 : vector<8x128xf32>
    %cst_22 = arith.constant 0.000000e+00 : f32
    %63 = vector.broadcast %cst_22 : f32 to vector<8x128xf32>
    %64 = arith.maximumf %62, %63 : vector<8x128xf32>
    %c0_23 = arith.constant 0 : index
    %c0_24 = arith.constant 0 : index
    %c0_25 = arith.constant 0 : index
    %65 = vector.load %arg3[%c0_23, %c0_24, %c0_25] : memref<1x128x128xf32, #tpu.memory_space<vmem>>, vector<1x128x128xf32>
    %66 = vector.shape_cast %65 : vector<1x128x128xf32> to vector<128x128xf32>
    %c1 = arith.constant 1 : index
    %c0_26 = arith.constant 0 : index
    %c0_27 = arith.constant 0 : index
    %67 = vector.load %arg5[%c1, %c0_26, %c0_27] : memref<2x5x128xf32, #tpu.memory_space<vmem>>, vector<1x5x128xf32>
    %68 = vector.shape_cast %67 : vector<1x5x128xf32> to vector<5x128xf32>
    %69 = vector.extract_strided_slice %68 {offsets = [0, 0], sizes = [1, 128], strides = [1, 1]} : vector<5x128xf32> to vector<1x128xf32>
    %70 = vector.extract_strided_slice %68 {offsets = [1, 0], sizes = [1, 128], strides = [1, 1]} : vector<5x128xf32> to vector<1x128xf32>
    %71 = vector.extract_strided_slice %68 {offsets = [2, 0], sizes = [1, 128], strides = [1, 1]} : vector<5x128xf32> to vector<1x128xf32>
    %72 = vector.extract_strided_slice %68 {offsets = [3, 0], sizes = [1, 128], strides = [1, 1]} : vector<5x128xf32> to vector<1x128xf32>
    %73 = vector.extract_strided_slice %68 {offsets = [4, 0], sizes = [1, 128], strides = [1, 1]} : vector<5x128xf32> to vector<1x128xf32>
    %cst_28 = arith.constant dense<0.000000e+00> : vector<8x128xf32>
    %74 = tpu.matmul %64, %66, %cst_28 {dimension_numbers = #tpu.dot_dimension_numbers<[1], [0], [0], [1], [0, 0, 1, 1], [], []>} : vector<8x128xf32>, vector<128x128xf32>, vector<8x128xf32> -> vector<8x128xf32>
    %75 = vector.broadcast %69 : vector<1x128xf32> to vector<8x128xf32>
    %76 = arith.addf %74, %75 : vector<8x128xf32>
    %cst_29 = arith.constant dense<0.000000e+00> : vector<8xf32>
    %77 = vector.multi_reduction <add>, %76, %cst_29 [1] : vector<8x128xf32> to vector<8xf32>
    %78 = vector.shape_cast %77 : vector<8xf32> to vector<8x1xf32>
    %cst_30 = arith.constant 3.125000e-02 : f32
    %79 = vector.broadcast %cst_30 : f32 to vector<8x1xf32>
    %80 = arith.mulf %78, %79 : vector<8x1xf32>
    %81 = arith.mulf %76, %76 : vector<8x128xf32>
    %cst_31 = arith.constant dense<0.000000e+00> : vector<8xf32>
    %82 = vector.multi_reduction <add>, %81, %cst_31 [1] : vector<8x128xf32> to vector<8xf32>
    %83 = vector.shape_cast %82 : vector<8xf32> to vector<8x1xf32>
    %cst_32 = arith.constant 3.125000e-02 : f32
    %84 = vector.broadcast %cst_32 : f32 to vector<8x1xf32>
    %85 = arith.mulf %83, %84 : vector<8x1xf32>
    %86 = arith.mulf %80, %80 : vector<8x1xf32>
    %87 = arith.subf %85, %86 : vector<8x1xf32>
    %88 = vector.broadcast %80 : vector<8x1xf32> to vector<8x128xf32>
    %89 = arith.subf %76, %88 : vector<8x128xf32>
    %cst_33 = arith.constant 9.99999974E-6 : f32
    %90 = vector.broadcast %cst_33 : f32 to vector<8x1xf32>
    %91 = arith.addf %87, %90 : vector<8x1xf32>
    %92 = math.rsqrt %91 : vector<8x1xf32>
    %93 = vector.broadcast %92 : vector<8x1xf32> to vector<8x128xf32>
    %94 = arith.mulf %89, %93 : vector<8x128xf32>
    %95 = vector.broadcast %70 : vector<1x128xf32> to vector<8x128xf32>
    %96 = arith.mulf %94, %95 : vector<8x128xf32>
    %97 = vector.broadcast %71 : vector<1x128xf32> to vector<8x128xf32>
    %98 = arith.addf %96, %97 : vector<8x128xf32>
    %cst_34 = arith.constant 0.000000e+00 : f32
    %99 = vector.broadcast %cst_34 : f32 to vector<8x128xf32>
    %100 = arith.maximumf %98, %99 : vector<8x128xf32>
    %c1_35 = arith.constant 1 : index
    %c0_36 = arith.constant 0 : index
    %c0_37 = arith.constant 0 : index
    %101 = vector.load %arg4[%c1_35, %c0_36, %c0_37] : memref<2x128x256xf32, #tpu.memory_space<vmem>>, vector<1x128x256xf32>
    %102 = vector.shape_cast %101 : vector<1x128x256xf32> to vector<128x256xf32>
    %cst_38 = arith.constant dense<0.000000e+00> : vector<8x256xf32>
    %103 = tpu.matmul %100, %102, %cst_38 {dimension_numbers = #tpu.dot_dimension_numbers<[1], [0], [0], [1], [0, 0, 1, 1], [], []>} : vector<8x128xf32>, vector<128x256xf32>, vector<8x256xf32> -> vector<8x256xf32>
    %104 = vector.extract_strided_slice %103 {offsets = [0, 0], sizes = [8, 128], strides = [1, 1]} : vector<8x256xf32> to vector<8x128xf32>
    %105 = vector.broadcast %72 : vector<1x128xf32> to vector<8x128xf32>
    %106 = arith.addf %104, %105 : vector<8x128xf32>
    %107 = math.tanh %106 : vector<8x128xf32>
    %108 = vector.extract_strided_slice %103 {offsets = [0, 128], sizes = [8, 128], strides = [1, 1]} : vector<8x256xf32> to vector<8x128xf32>
    %109 = vector.broadcast %73 : vector<1x128xf32> to vector<8x128xf32>
    %110 = arith.addf %108, %109 : vector<8x128xf32>
    %cst_39 = arith.constant 0.000000e+00 : f32
    %111 = vector.broadcast %cst_39 : f32 to vector<8x128xf32>
    %112 = arith.maximumf %110, %111 : vector<8x128xf32>
    %cst_40 = arith.constant 1.000000e-01 : f32
    %113 = vector.broadcast %cst_40 : f32 to vector<8x128xf32>
    %114 = arith.addf %107, %113 : vector<8x128xf32>
    %cst_41 = arith.constant 1.000000e-01 : f32
    %115 = vector.broadcast %cst_41 : f32 to vector<8x128xf32>
    %116 = arith.addf %112, %115 : vector<8x128xf32>
    %cst_42 = arith.constant 9.99999997E-7 : f32
    %117 = vector.broadcast %cst_42 : f32 to vector<8x128xf32>
    %118 = arith.addf %116, %117 : vector<8x128xf32>
    %cst_43 = arith.constant 9.99999974E-6 : f32
    %119 = vector.broadcast %cst_43 : f32 to vector<8x128xf32>
    %120 = arith.maximumf %118, %119 : vector<8x128xf32>
    %121 = tpu.reciprocal %120 {approx = true} : vector<8x128xf32> -> vector<8x128xf32>
    %122 = arith.mulf %120, %121 : vector<8x128xf32>
    %cst_44 = arith.constant 2.000000e+00 : f32
    %123 = vector.broadcast %cst_44 : f32 to vector<8x128xf32>
    %124 = arith.subf %123, %122 : vector<8x128xf32>
    %125 = arith.mulf %121, %124 : vector<8x128xf32>
    %126 = arith.mulf %114, %125 : vector<8x128xf32>
    %127 = math.tanh %126 : vector<8x128xf32>
    %cst_45 = arith.constant 0.000000e+00 : f32
    %128 = vector.broadcast %cst_45 : f32 to vector<8x128xf32>
    %129 = arith.maximumf %127, %128 : vector<8x128xf32>
    %c0_46 = arith.constant 0 : index
    %c0_47 = arith.constant 0 : index
    %130 = vector.load %arg6[%c0_46, %c0_47] : memref<128x128xf32, #tpu.memory_space<vmem>>, vector<128x128xf32>
    %cst_48 = arith.constant dense<0.000000e+00> : vector<8x128xf32>
    %131 = tpu.matmul %129, %130, %cst_48 {dimension_numbers = #tpu.dot_dimension_numbers<[1], [0], [0], [1], [0, 0, 1, 1], [], []>} : vector<8x128xf32>, vector<128x128xf32>, vector<8x128xf32> -> vector<8x128xf32>
    %c0_49 = arith.constant 0 : index
    %c0_50 = arith.constant 0 : index
    %132 = vector.load %arg7[%c0_49, %c0_50] : memref<1x128xf32, #tpu.memory_space<vmem>>, vector<1x128xf32>
    %133 = vector.broadcast %132 : vector<1x128xf32> to vector<8x128xf32>
    %134 = arith.addf %131, %133 : vector<8x128xf32>
    %c0_51 = arith.constant 0 : index
    %c0_52 = arith.constant 0 : index
    %135 = vector.load %arg8[%c0_51, %c0_52] : memref<8x128xf32, #tpu.memory_space<vmem>>, vector<8x128xf32>
    tpu.vector_store %arg8[%c0_51, %c0_52], %134 {strides = array<i32>} : memref<8x128xf32, #tpu.memory_space<vmem>>, vector<8x128xf32>,
    return
  }
  func.func @transform_0(%arg0: i32) -> (i32, i32) {
    %c0_i32 = arith.constant 0 : i32
    %c0_i32_0 = arith.constant 0 : i32
    return %arg0, %c0_i32 : i32, i32
  }
  func.func @transform_1(%arg0: i32) -> (i32, i32) {
    %c0_i32 = arith.constant 0 : i32
    %c0_i32_0 = arith.constant 0 : i32
    %c0_i32_1 = arith.constant 0 : i32
    return %c0_i32, %c0_i32_0 : i32, i32
  }
  func.func @transform_2(%arg0: i32) -> (i32, i32, i32) {
    %c0_i32 = arith.constant 0 : i32
    %c0_i32_0 = arith.constant 0 : i32
    %c0_i32_1 = arith.constant 0 : i32
    %c0_i32_2 = arith.constant 0 : i32
    return %c0_i32, %c0_i32_0, %c0_i32_1 : i32, i32, i32
  }
  func.func @transform_3(%arg0: i32) -> (i32, i32, i32) {
    %c0_i32 = arith.constant 0 : i32
    %c0_i32_0 = arith.constant 0 : i32
    %c0_i32_1 = arith.constant 0 : i32
    %c0_i32_2 = arith.constant 0 : i32
    return %c0_i32, %c0_i32_0, %c0_i32_1 : i32, i32, i32
  }
  func.func @transform_4(%arg0: i32) -> (i32, i32, i32) {
    %c0_i32 = arith.constant 0 : i32
    %c0_i32_0 = arith.constant 0 : i32
    %c0_i32_1 = arith.constant 0 : i32
    %c0_i32_2 = arith.constant 0 : i32
    return %c0_i32, %c0_i32_0, %c0_i32_1 : i32, i32, i32
  }
  func.func @transform_5(%arg0: i32) -> (i32, i32) {
    %c0_i32 = arith.constant 0 : i32
    %c0_i32_0 = arith.constant 0 : i32
    %c0_i32_1 = arith.constant 0 : i32
    return %c0_i32, %c0_i32_0 : i32, i32
  }
  func.func @transform_6(%arg0: i32) -> (i32, i32) {
    %c0_i32 = arith.constant 0 : i32
    %c0_i32_0 = arith.constant 0 : i32
    %c0_i32_1 = arith.constant 0 : i32
    return %c0_i32, %c0_i32_0 : i32, i32
  }
  func.func @transform_7(%arg0: i32) -> (i32, i32) {
    %c0_i32 = arith.constant 0 : i32
    %c0_i32_0 = arith.constant 0 : i32
    return %arg0, %c0_i32 : i32, i32
  }
}

</mosaic_0001>

<bundles_post_ra>
// kernel: evolving_network_forward.1
= control target key start
LH: loop header
LB: loop body
LE: loop exit
PB: predicated region body
PF: predicated region fallthrough
CT: control target
= control target key end

     0   :  { %12 = vsyncpa [#allocation3], 0  ;;  %s1057_s0 = inlined_call_operand.vmem [shape: f32[8,16], index: 0, kind: input, shape index: {}]   ;;  %s1058_s1 = inlined_call_operand.vmem [shape: f32[16,128], index: 1, kind: input, shape index: {}]   ;;  %s1059_s2 = inlined_call_operand.hbm [shape: f32[1,128,128], index: 2, kind: input, shape index: {}]   ;;  %s1060_s3 = inlined_call_operand.hbm [shape: f32[2,128,256], index: 3, kind: input, shape index: {}]   ;;  %s1061_s4 = inlined_call_operand.vmem [shape: f32[2,5,128], index: 4, kind: input, shape index: {}]   ;;  %s1062_s5 = inlined_call_operand.hbm [shape: f32[128,128], index: 5, kind: input, shape index: {}]   ;;  %s1063_s6 = inlined_call_operand.vmem [shape: f32[1,128], index: 6, kind: input, shape index: {}]   ;;  %s1064_s7 = inlined_call_operand.hbm [shape: f32[8,128], index: 7, kind: output, shape index: {}]  }
   0x1   :  { %13 = vsyncpa [#allocation6], 0 }
   0x2   :  { %14 = vsyncpa [#allocation4], 0  ;;  %s882_s24 = smov [#allocation5]  }
   0x3   :  { %s36_s25 = sshll.u32 %s882_s24, 4  ;;  %s37_s25 = int_to_ptr.vmem [resolvable:$true] %s36_s25 }
   0x4   :  { %s804_s26 = scalar_lea.vmem %s37_s25, 8192  ;;  %p809_p1 = scmp.lt.s32.totalorder %s37_s25, %s37_s25 }
   0x5   :  { %p805_p0 = scmp.ne.s32.totalorder %s37_s25, %s804_s26  ;;  %p810_p2 = scmp.lt.s32.totalorder %s804_s26, %s804_s26 }
   0x7   :  { %p811_p3 = por %p810_p2, %p809_p1 }
   0x9   :  { %p812_p4 = pnand %p811_p3, %p805_p0 }
   0xb   :  { %815 = shalt.err (!%p812_p4)
}
   0xc   :  { %s883_s27 = smov 256   ;;  %s884_s28 = smov 16  }
   0xd   :  { %42 = dma.hbm_to_vmem [thread:$0]  %s1060_s3, 8192, %s37_s25, [#allocation6], %s883_s27, %s883_s27, %s884_s28  }
   0xe   :  { %s885_s8 = smov [#allocation2]  }
   0xf   :  { %s24_s9 = sshll.u32 %s885_s8, 4  ;;  %s25_s9 = int_to_ptr.vmem [resolvable:$true] %s24_s9 }
  0x10   :  { %s824_s10 = scalar_lea.vmem %s25_s9, 2048  ;;  %p829_p6 = scmp.lt.s32.totalorder %s25_s9, %s25_s9 }
  0x11   :  { %p825_p5 = scmp.ne.s32.totalorder %s25_s9, %s824_s10  ;;  %p830_p7 = scmp.lt.s32.totalorder %s824_s10, %s824_s10 }
  0x13   :  { %p831_p8 = por %p830_p7, %p829_p6 }
  0x15   :  { %p832_p9 = pnand %p831_p8, %p825_p5 }
  0x17   :  { %835 = shalt.err (!%p832_p9)
}
  0x18   :  { %s886_s11 = smov 128   ;;  %s887_s12 = smov 8  }
  0x19   :  { %30 = dma.hbm_to_vmem [thread:$0]  %s1059_s2, 2048, %s25_s9, [#allocation3], %s886_s11, %s886_s11, %s887_s12  }
  0x1a   :  { %s888_s15 = smov [#allocation7]  }
  0x1b   :  { %s50_s16 = sshll.u32 %s888_s15, 4  ;;  %s51_s16 = int_to_ptr.vmem [resolvable:$true] %s50_s16 }
  0x1c   :  { %s844_s3 = scalar_lea.vmem %s51_s16, 2048  ;;  %p849_p11 = scmp.lt.s32.totalorder %s51_s16, %s51_s16 }
  0x1d   :  { %p845_p10 = scmp.ne.s32.totalorder %s51_s16, %s844_s3  ;;  %p850_p12 = scmp.lt.s32.totalorder %s844_s3, %s844_s3 }
  0x1f   :  { %p851_p13 = por %p850_p12, %p849_p11 }
  0x21   :  { %p852_p0 = pnand %p851_p13, %p845_p10 }
  0x23   :  { %855 = shalt.err (!%p852_p0)
}
  0x24   :  { %56 = dma.hbm_to_vmem [thread:$0]  %s1062_s5, 2048, %s51_s16, [#allocation6], %s886_s11, %s886_s11, %s887_s12  }
  0x25   :  { %876 = dma.done.wait [#allocation3], 2048  }
  0x26   :  { %877 = vsyncadd [#allocation3], 4294965248 }
  0x27   :  { %878 = dma.done.wait [#allocation6], 10240  }
  0x28   :  { %879 = vsyncadd [#allocation6], 4294957056  ;;  %v889_v0 = vmov 0.0   ;;  %vm890_vm0 = vmmov 0   ;;  %v70_v1 = vld [vmem:[%s1058_s1 + $0x8] sm:$0xff]  ;;  %v69_v2 = vld [vmem:[%s1058_s1] sm:$0xff]  ;;  %v72_v4 = vlaneseq }
  0x29   :  { %693 = vmatprep.subr.mxu0 %v889_v0  ;;  %697 = vmatprep.mubr.msk.f32.mxu0 %vm890_vm0, %v889_v0  ;;  %v68_v3 = vld [vmem:[%s1057_s0] sm:$0xff]  ;;  %vm76_vm1 = vcmask 130048   ;;  %v205_v13 = vld [vmem:[#allocation5 + $0xf8] sm:$0xff]  ;;  %v204_v14 = vld [vmem:[#allocation5 + $0xf0] sm:$0xff]  ;;  %s891_s26 = smov [#allocation8]  }
  0x2a   :  { %270 = vmatprep.mubr.f32.mxu1 %v889_v0  ;;  %694 = vmatpush3.msra.mxu0 %v70_v1  ;;  %v958_v5 = vshrl.u32 %v72_v4, 7  ;;  %v964_v7 = vld [vmem:[%s1061_s4] sm:$0x1f]  ;;  %v203_v15 = vld [vmem:[#allocation5 + $0xe8] sm:$0xff]  ;;  %v201_v17 = vld [vmem:[#allocation5 + $0xd8] sm:$0xff]  ;;  %s643_s27 = sshll.u32 %s891_s26, 4  ;;  %s644_s27 = int_to_ptr.vmem [resolvable:$true] %s643_s27 }
  0x2b   :  { %695 = vmatprep.subr.mxu0 %v889_v0  ;;  %206 = vmatprep.subr.mxu1 %v205_v13  ;;  %v202_v16 = vld [vmem:[#allocation5 + $0xe0] sm:$0xff]  ;;  %v200_v18 = vld [vmem:[#allocation5 + $0xd0] sm:$0xff]  ;;  %v199_v19 = vld [vmem:[#allocation5 + $0xc8] sm:$0xff]  ;;  %s856_s28 = scalar_lea.vmem %s644_s27, 128  ;;  %p861_p2 = scmp.lt.s32.totalorder %s644_s27, %s644_s27 }
  0x2c   :  { %696 = vmatpush3.msra.mxu0 %v69_v2  ;;  %v74_v6 = vsub.s32 0, %v958_v5  ;;  %207 = vmatpush1.msra.mxu1 %v204_v14  ;;  %v198_v20 = vld [vmem:[#allocation5 + $0xc0] sm:$0xff]  ;;  %v197_v21 = vld [vmem:[#allocation5 + $0xb8] sm:$0xff]  ;;  %v196_v22 = vld [vmem:[#allocation5 + $0xb0] sm:$0xff]  ;;  %v165_v52 = vsub.s32 1, %v958_v5  ;;  %v170_v53 = vsub.s32 2, %v958_v5  ;;  %p857_p1 = scmp.ne.s32.totalorder %s644_s27, %s856_s28  ;;  %p862_p3 = scmp.lt.s32.totalorder %s856_s28, %s856_s28 }
  0x2d   :  { %698 = vmatmul.mubr.msk.f32.vlgmr.msra.gmra.mxu0 %vm76_vm1, %v68_v3  ;;  %700 = vmatprep.subr.mxu0 %v889_v0  ;;  %v195_v23 = vld [vmem:[#allocation5 + $0xa8] sm:$0xff]  ;;  %v194_v24 = vld [vmem:[#allocation5 + $0xa0] sm:$0xff]  ;;  %v193_v25 = vld [vmem:[#allocation5 + $0x98] sm:$0xff] }
  0x2e   :  { %732 = vmatprep.mubr.msk.f32.mxu0 %vm890_vm0, %v889_v0  ;;  %v75_v8 = vrot.slane %v964_v7, %v74_v6  ;;  %208 = vmatprep.subr.mxu1 %v203_v15  ;;  %v192_v26 = vld [vmem:[#allocation5 + $0x90] sm:$0xff]  ;;  %v191_v27 = vld [vmem:[#allocation5 + $0x88] sm:$0xff]  ;;  %v190_v28 = vld [vmem:[#allocation5 + $0x80] sm:$0xff]  ;;  %v166_v55 = vrot.slane %v964_v7, %v165_v52  ;;  %v171_v58 = vrot.slane %v964_v7, %v170_v53  ;;  %p863_p4 = por %p862_p3, %p861_p2 }
  0x2f   :  { %209 = vmatpush1.msra.mxu1 %v202_v16  ;;  %v189_v29 = vld [vmem:[#allocation5 + $0x78] sm:$0xff]  ;;  %v188_v30 = vld [vmem:[#allocation5 + $0x70] sm:$0xff]  ;;  %v187_v31 = vld [vmem:[#allocation5 + $0x68] sm:$0xff] }
  0x30   :  { %210 = vmatprep.subr.mxu1 %v201_v17  ;;  %v186_v32 = vld [vmem:[#allocation5 + $0x60] sm:$0xff]  ;;  %v185_v33 = vld [vmem:[#allocation5 + $0x58] sm:$0xff]  ;;  %v184_v34 = vld [vmem:[#allocation5 + $0x50] sm:$0xff]  ;;  %p864_p5 = pnand %p863_p4, %p857_p1 }
  0x31   :  { %211 = vmatpush1.msra.mxu1 %v200_v18  ;;  %v183_v35 = vld [vmem:[#allocation5 + $0x48] sm:$0xff]  ;;  %v182_v36 = vld [vmem:[#allocation5 + $0x40] sm:$0xff]  ;;  %v181_v37 = vld [vmem:[#allocation5 + $0x38] sm:$0xff]  ;;  %v285_v18 = vsub.s32 4, %v958_v5 }
  0x32   :  { %212 = vmatprep.subr.mxu1 %v199_v19  ;;  %v180_v38 = vld [vmem:[#allocation5 + $0x30] sm:$0xff]  ;;  %v179_v39 = vld [vmem:[#allocation5 + $0x28] sm:$0xff]  ;;  %v178_v40 = vld [vmem:[#allocation5 + $0x20] sm:$0xff] }
  0x33   :  { %213 = vmatpush1.msra.mxu1 %v198_v20  ;;  %v177_v41 = vld [vmem:[#allocation5 + $0x18] sm:$0xff]  ;;  %v176_v42 = vld [vmem:[#allocation5 + $0x10] sm:$0xff]  ;;  %v175_v43 = vld [vmem:[#allocation5 + $0x8] sm:$0xff]  ;;  %v286_v19 = vrot.slane %v964_v7, %v285_v18 }
  0x34   :  { %214 = vmatprep.subr.mxu1 %v197_v21  ;;  %v174_v44 = vld [vmem:[#allocation5] sm:$0xff]  ;;  %v315_v62 = vld [vmem:[#allocation2 + $0x78] sm:$0xff]  ;;  %v314_v63 = vld [vmem:[#allocation2 + $0x70] sm:$0xff] }
  0x35   :  { %215 = vmatpush1.msra.mxu1 %v196_v22  ;;  %701 = vmatpush3.msra.mxu0 %v315_v62  ;;  %v313_v1 = vld [vmem:[#allocation2 + $0x68] sm:$0xff]  ;;  %v312_v2 = vld [vmem:[#allocation2 + $0x60] sm:$0xff]  ;;  %v311_v3 = vld [vmem:[#allocation2 + $0x58] sm:$0xff]  ;;  %v279_v22 = vsub.s32 3, %v958_v5 }
  0x36   :  { %216 = vmatprep.subr.mxu1 %v195_v23  ;;  %702 = vmatprep.subr.mxu0 %v889_v0  ;;  %v310_v4 = vld [vmem:[#allocation2 + $0x50] sm:$0xff]  ;;  %v304_v13 = vld [vmem:[#allocation2 + $0x20] sm:$0xff]  ;;  %v303_v14 = vld [vmem:[#allocation2 + $0x18] sm:$0xff] }
  0x37   :  { %217 = vmatpush1.msra.mxu1 %v194_v24  ;;  %703 = vmatpush3.msra.mxu0 %v314_v63  ;;  %v302_v15 = vld [vmem:[#allocation2 + $0x10] sm:$0xff]  ;;  %v301_v16 = vld [vmem:[#allocation2 + $0x8] sm:$0xff]  ;;  %v300_v17 = vld [vmem:[#allocation2] sm:$0xff] }
  0x38   :  { %218 = vmatprep.subr.mxu1 %v193_v25  ;;  %704 = vmatprep.subr.mxu0 %v889_v0  ;;  %v280_v25 = vrot.slane %v964_v7, %v279_v22  ;;  %v1013_v7 = vld [vmem:[%s1061_s4 + $0x8] sm:$0x1f]  ;;  %v431_v62 = vld [vmem:[#allocation5 + $0x170] sm:$0xff]  ;;  %v655_v5 = vld [vmem:[%s1063_s6] ss:$0 sm:$0xff] }
  0x39   :  { %219 = vmatpush1.msra.mxu1 %v192_v26  ;;  %705 = vmatpush3.msra.mxu0 %v313_v1  ;;  %v430_v63 = vld [vmem:[#allocation5 + $0x168] sm:$0xff]  ;;  %v429_v1 = vld [vmem:[#allocation5 + $0x160] sm:$0xff] }
  0x3a   :  { %220 = vmatprep.subr.mxu1 %v191_v27  ;;  %706 = vmatprep.subr.mxu0 %v889_v0 }
  0x3b   :  { %221 = vmatpush1.msra.mxu1 %v190_v28  ;;  %707 = vmatpush3.msra.mxu0 %v312_v2  ;;  %v428_v2 = vld [vmem:[#allocation5 + $0x158] sm:$0xff] }
  0x3c   :  { %222 = vmatprep.subr.mxu1 %v189_v29  ;;  %708 = vmatprep.subr.mxu0 %v889_v0 }
  0x3d   :  { %223 = vmatpush1.msra.mxu1 %v188_v30  ;;  %709 = vmatpush3.msra.mxu0 %v311_v3  ;;  %v427_v3 = vld [vmem:[#allocation5 + $0x150] sm:$0xff] }
  0x3e   :  { %224 = vmatprep.subr.mxu1 %v187_v31  ;;  %710 = vmatprep.subr.mxu0 %v889_v0 }
  0x3f   :  { %225 = vmatpush1.msra.mxu1 %v186_v32  ;;  %711 = vmatpush3.msra.mxu0 %v310_v4  ;;  %v426_v4 = vld [vmem:[#allocation5 + $0x148] sm:$0xff] }
  0x40   :  { %226 = vmatprep.subr.mxu1 %v185_v33  ;;  %712 = vmatprep.subr.mxu0 %v889_v0 }
  0x41   :  { %227 = vmatpush1.msra.mxu1 %v184_v34 }
  0x42   :  { %228 = vmatprep.subr.mxu1 %v183_v35 }
  0x43   :  { %229 = vmatpush1.msra.mxu1 %v182_v36 }
  0x44   :  { %230 = vmatprep.subr.mxu1 %v181_v37 }
  0x45   :  { %231 = vmatpush1.msra.mxu1 %v180_v38 }
  0x46   :  { %232 = vmatprep.subr.mxu1 %v179_v39  ;;  %v321_v39 = vrot.slane %v1013_v7, %v74_v6  ;;  %v443_v6 = vld [vmem:[#allocation5 + $0x1d0] sm:$0xff] }
  0x47   :  { %233 = vmatpush1.msra.mxu1 %v178_v40 }
  0x48   :  { %234 = vmatprep.subr.mxu1 %v177_v41 }
  0x49   :  { %235 = vmatpush1.msra.mxu1 %v176_v42 }
  0x4a   :  { %236 = vmatprep.subr.mxu1 %v175_v43 }
  0x4b   :  { %237 = vmatpush1.msra.mxu1 %v174_v44  ;;  %v448_v44 = vld [vmem:[#allocation5 + $0x1f8] sm:$0xff] }
  0x4c   :  { %449 = vmatprep.subr.mxu1 %v448_v44  ;;  %v546_v44 = vld [vmem:[#allocation7 + $0x18] sm:$0xff] }
  0xed   :  { %v146_v9 = vpop.f32.mrf.mxu0 }
  0xee   :  { %v969_v10 = vadd.f32 %v146_v9, %v75_v8  ;;  %v309_v8 = vld [vmem:[#allocation2 + $0x48] sm:$0xff]  ;;  %v308_v9 = vld [vmem:[#allocation2 + $0x40] sm:$0xff] }
  0xef   :  { %v699_v11 = vpop.f32.mrf.mxu0  ;;  %713 = vmatpush3.msra.mxu0 %v309_v8  ;;  %v425_v8 = vld [vmem:[#allocation5 + $0x140] sm:$0xff] }
  0xf0   :  { %150 = vadd.xlane.f32.xlu0 %v969_v10  ;;  %v153_v12 = vmul.f32 %v969_v10, %v969_v10  ;;  %714 = vmatprep.subr.mxu0 %v889_v0  ;;  %v306_v11 = vld [vmem:[#allocation2 + $0x30] sm:$0xff] }
  0xf1   :  { %715 = vmatpush3.msra.mxu0 %v308_v9  ;;  %v424_v9 = vld [vmem:[#allocation5 + $0x138] sm:$0xff] }
  0xf2   :  { %716 = vmatprep.subr.mxu0 %v889_v0 }
  0xf4   :  { %154 = vadd.xlane.f32.xlu0 %v153_v12  ;;  %v305_v12 = vld [vmem:[#allocation2 + $0x28] sm:$0xff] }
 0x179   :  { %v151_v45 = vpop.xlane.xlu0 %150 }
 0x17a   :  { %v152_v46 = vmul.f32 0.03125, %v151_v45  ;;  %v447_v45 = vld [vmem:[#allocation5 + $0x1f0] sm:$0xff] }
 0x17c   :  { %v157_v48 = vmul.f32 %v152_v46, %v152_v46  ;;  %v159_v54 = vsub.f32 %v969_v10, %v152_v46  ;;  %v307_v10 = vld [vmem:[#allocation2 + $0x38] sm:$0xff]  ;;  %v446_v46 = vld [vmem:[#allocation5 + $0x1e8] sm:$0xff] }
 0x17d   :  { %v155_v47 = vpop.xlane.xlu0 %154  ;;  %717 = vmatpush3.msra.mxu0 %v307_v10  ;;  %v423_v10 = vld [vmem:[#allocation5 + $0x130] sm:$0xff] }
 0x17e   :  { %v156_v49 = vmul.f32 0.03125, %v155_v47  ;;  %718 = vmatprep.subr.mxu0 %v889_v0  ;;  %v445_v47 = vld [vmem:[#allocation5 + $0x1e0] sm:$0xff] }
 0x17f   :  { %719 = vmatpush3.msra.mxu0 %v306_v11  ;;  %v422_v11 = vld [vmem:[#allocation5 + $0x128] sm:$0xff] }
 0x180   :  { %v158_v50 = vsub.f32 %v156_v49, %v157_v48  ;;  %720 = vmatprep.subr.mxu0 %v889_v0  ;;  %v444_v48 = vld [vmem:[#allocation5 + $0x1d8] sm:$0xff]  ;;  %v442_v49 = vld [vmem:[#allocation5 + $0x1c8] sm:$0xff] }
 0x181   :  { %721 = vmatpush3.msra.mxu0 %v305_v12  ;;  %v421_v12 = vld [vmem:[#allocation5 + $0x120] sm:$0xff] }
 0x182   :  { %v160_v51 = vadd.f32 1e-05, %v158_v50  ;;  %722 = vmatprep.subr.mxu0 %v889_v0  ;;  %v441_v50 = vld [vmem:[#allocation5 + $0x1c0] sm:$0xff] }
 0x183   :  { %723 = vmatpush3.msra.mxu0 %v304_v13  ;;  %v420_v13 = vld [vmem:[#allocation5 + $0x118] sm:$0xff] }
 0x184   :  { %780 = vrsqrt.f32 %v160_v51  ;;  %724 = vmatprep.subr.mxu0 %v889_v0  ;;  %v440_v51 = vld [vmem:[#allocation5 + $0x1b8] sm:$0xff] }
 0x185   :  { %725 = vmatpush3.msra.mxu0 %v303_v14  ;;  %v419_v14 = vld [vmem:[#allocation5 + $0x110] sm:$0xff] }
 0x186   :  { %726 = vmatprep.subr.mxu0 %v889_v0 }
 0x187   :  { %727 = vmatpush3.msra.mxu0 %v302_v15  ;;  %v418_v15 = vld [vmem:[#allocation5 + $0x108] sm:$0xff] }
 0x188   :  { %728 = vmatprep.subr.mxu0 %v889_v0 }
 0x189   :  { %729 = vmatpush3.msra.mxu0 %v301_v16  ;;  %v417_v16 = vld [vmem:[#allocation5 + $0x100] sm:$0xff] }
 0x18a   :  { %730 = vmatprep.subr.mxu0 %v889_v0 }
 0x18b   :  { %731 = vmatpush3.msra.mxu0 %v300_v17 }
 0x18c   :  { %735 = vmatprep.subr.mxu0 %v889_v0 }
 0x191   :  { %v781_v56 = vpop.eup %780 }
 0x192   :  { %v162_v57 = vmul.f32 %v781_v56, %v159_v54  ;;  %v439_v54 = vld [vmem:[#allocation5 + $0x1b0] sm:$0xff]  ;;  %v437_v56 = vld [vmem:[#allocation5 + $0x1a0] sm:$0xff] }
 0x194   :  { %v167_v59 = vmul.f32 %v166_v55, %v162_v57  ;;  %v438_v55 = vld [vmem:[#allocation5 + $0x1a8] sm:$0xff]  ;;  %v436_v57 = vld [vmem:[#allocation5 + $0x198] sm:$0xff] }
 0x196   :  { %v172_v60 = vadd.f32 %v171_v58, %v167_v59  ;;  %v435_v58 = vld [vmem:[#allocation5 + $0x190] sm:$0xff]  ;;  %v434_v59 = vld [vmem:[#allocation5 + $0x188] sm:$0xff] }
 0x198   :  { %v173_v61 = vmax.f32 %v172_v60, 0.0  ;;  %v433_v60 = vld [vmem:[#allocation5 + $0x180] sm:$0xff] }
 0x19a   :  { %271 = vmatmul.mubr.f32.vlgmr.msra.gmra.mxu1 %v173_v61  ;;  %v432_v61 = vld [vmem:[#allocation5 + $0x178] sm:$0xff] }
 0x19b   :  { %513 = vmatprep.mubr.f32.mxu1 %v889_v0  ;;  %450 = vmatpush1.msra.mxu1 %v447_v45  ;;  %v545_v45 = vld [vmem:[#allocation7 + $0x10] sm:$0xff] }
 0x19c   :  { %451 = vmatprep.subr.mxu1 %v446_v46  ;;  %v544_v46 = vld [vmem:[#allocation7 + $0x8] sm:$0xff] }
 0x19d   :  { %452 = vmatpush1.msra.mxu1 %v445_v47  ;;  %v543_v47 = vld [vmem:[#allocation7] sm:$0xff] }
 0x19e   :  { %453 = vmatprep.subr.mxu1 %v444_v48  ;;  %v529_v48 = vrot.slane %v1013_v7, %v285_v18 }
 0x19f   :  { %454 = vmatpush1.msra.mxu1 %v443_v6 }
 0x1a0   :  { %455 = vmatprep.subr.mxu1 %v442_v49 }
 0x1a1   :  { %456 = vmatpush1.msra.mxu1 %v441_v50 }
 0x1a2   :  { %457 = vmatprep.subr.mxu1 %v440_v51 }
 0x1a3   :  { %458 = vmatpush1.msra.mxu1 %v439_v54  ;;  %v523_v54 = vrot.slane %v1013_v7, %v279_v22 }
 0x1a4   :  { %459 = vmatprep.subr.mxu1 %v438_v55 }
 0x1a5   :  { %460 = vmatpush1.msra.mxu1 %v437_v56 }
 0x1a6   :  { %461 = vmatprep.subr.mxu1 %v436_v57 }
 0x1a7   :  { %462 = vmatpush1.msra.mxu1 %v435_v58 }
 0x1a8   :  { %463 = vmatprep.subr.mxu1 %v434_v59 }
 0x1a9   :  { %464 = vmatpush1.msra.mxu1 %v433_v60 }
 0x1aa   :  { %465 = vmatprep.subr.mxu1 %v432_v61 }
 0x1ab   :  { %466 = vmatpush1.msra.mxu1 %v431_v62 }
 0x1ac   :  { %467 = vmatprep.subr.mxu1 %v430_v63 }
 0x1ad   :  { %468 = vmatpush1.msra.mxu1 %v429_v1 }
 0x1ae   :  { %469 = vmatprep.subr.mxu1 %v428_v2 }
 0x1af   :  { %470 = vmatpush1.msra.mxu1 %v427_v3 }
 0x1b0   :  { %471 = vmatprep.subr.mxu1 %v426_v4 }
 0x1b1   :  { %472 = vmatpush1.msra.mxu1 %v425_v8 }
 0x1b2   :  { %473 = vmatprep.subr.mxu1 %v424_v9 }
 0x1b3   :  { %474 = vmatpush1.msra.mxu1 %v423_v10 }
 0x1b4   :  { %475 = vmatprep.subr.mxu1 %v422_v11 }
 0x1b5   :  { %476 = vmatpush1.msra.mxu1 %v421_v12 }
 0x1b6   :  { %477 = vmatprep.subr.mxu1 %v420_v13 }
 0x1b7   :  { %478 = vmatpush1.msra.mxu1 %v419_v14 }
 0x1b8   :  { %479 = vmatprep.subr.mxu1 %v418_v15 }
 0x1b9   :  { %480 = vmatpush1.msra.mxu1 %v417_v16 }
 0x25a   :  { %v272_v20 = vpop.f32.mrf.mxu1 }
 0x25b   :  { %v281_v28 = vadd.f32 %v280_v25, %v272_v20 }
 0x25c   :  { %v274_v21 = vpop.f32.mrf.mxu1 }
 0x25d   :  { %v287_v23 = vadd.f32 %v286_v19, %v274_v21 }
 0x25f   :  { %v288_v24 = vmax.f32 %v287_v23, 0.0 }
 0x261   :  { %v290_v26 = vadd.f32 0.1, %v288_v24 }
 0x263   :  { %v291_v27 = vadd.f32 1e-06, %v290_v26 }
 0x265   :  { %v292_v29 = vmax.f32 %v291_v27, 1e-05  ;;  %v408_v27 = vrot.slane %v1013_v7, %v165_v52  ;;  %v555_v52 = vld [vmem:[#allocation7 + $0x60] sm:$0xff] }
 0x267   :  { %782 = vrcp.f32 %v292_v29 }
 0x268   :  { %784 = vtanh.f32 %v281_v28 }
 0x274   :  { %v783_v30 = vpop.eup %782 }
 0x275   :  { %v294_v31 = vmul.f32 %v783_v30, %v292_v29  ;;  %v785_v32 = vpop.eup %784 }
 0x276   :  { %v289_v34 = vadd.f32 0.1, %v785_v32 }
 0x277   :  { %v295_v33 = vsub.f32 2.0, %v294_v31 }
 0x279   :  { %v296_v35 = vmul.f32 %v783_v30, %v295_v33  ;;  %v413_v30 = vrot.slane %v1013_v7, %v170_v53  ;;  %v554_v53 = vld [vmem:[#allocation7 + $0x58] sm:$0xff] }
 0x27b   :  { %v297_v36 = vmul.f32 %v296_v35, %v289_v34  ;;  %v558_v34 = vld [vmem:[#allocation7 + $0x78] sm:$0xff]  ;;  %v557_v35 = vld [vmem:[#allocation7 + $0x70] sm:$0xff] }
 0x27d   :  { %786 = vtanh.f32 %v297_v36  ;;  %v556_v36 = vld [vmem:[#allocation7 + $0x68] sm:$0xff] }
 0x28a   :  { %v787_v37 = vpop.eup %786 }
 0x28b   :  { %v299_v38 = vmax.f32 %v787_v37, 0.0  ;;  %v553_v37 = vld [vmem:[#allocation7 + $0x50] sm:$0xff] }
 0x28d   :  { %733 = vmatmul.mubr.f32.vlgmr.msra.gmra.mxu0 %v299_v38  ;;  %v552_v38 = vld [vmem:[#allocation7 + $0x48] sm:$0xff] }
 0x28e   :  { %767 = vmatprep.mubr.msk.f32.mxu0 %vm890_vm0, %v889_v0  ;;  %736 = vmatpush3.msra.mxu0 %v558_v34 }
 0x28f   :  { %737 = vmatprep.subr.mxu0 %v889_v0 }
 0x290   :  { %738 = vmatpush3.msra.mxu0 %v557_v35 }
 0x291   :  { %739 = vmatprep.subr.mxu0 %v889_v0 }
 0x292   :  { %740 = vmatpush3.msra.mxu0 %v556_v36 }
 0x293   :  { %741 = vmatprep.subr.mxu0 %v889_v0 }
 0x294   :  { %742 = vmatpush3.msra.mxu0 %v555_v52 }
 0x295   :  { %743 = vmatprep.subr.mxu0 %v889_v0 }
 0x296   :  { %744 = vmatpush3.msra.mxu0 %v554_v53 }
 0x297   :  { %745 = vmatprep.subr.mxu0 %v889_v0 }
 0x298   :  { %746 = vmatpush3.msra.mxu0 %v553_v37 }
 0x299   :  { %747 = vmatprep.subr.mxu0 %v889_v0 }
 0x29a   :  { %748 = vmatpush3.msra.mxu0 %v552_v38 }
 0x29b   :  { %749 = vmatprep.subr.mxu0 %v889_v0 }
 0x34d   :  { %v388_v40 = vpop.f32.mrf.mxu0 }
 0x34e   :  { %v1018_v41 = vadd.f32 %v388_v40, %v321_v39  ;;  %v551_v39 = vld [vmem:[#allocation7 + $0x40] sm:$0xff]  ;;  %v550_v40 = vld [vmem:[#allocation7 + $0x38] sm:$0xff] }
 0x34f   :  { %v734_v42 = vpop.f32.mrf.mxu0  ;;  %750 = vmatpush3.msra.mxu0 %v551_v39 }
 0x350   :  { %392 = vadd.xlane.f32.xlu1 %v1018_v41  ;;  %v395_v43 = vmul.f32 %v1018_v41, %v1018_v41  ;;  %751 = vmatprep.subr.mxu0 %v889_v0  ;;  %v548_v42 = vld [vmem:[#allocation7 + $0x28] sm:$0xff] }
 0x351   :  { %752 = vmatpush3.msra.mxu0 %v550_v40 }
 0x352   :  { %753 = vmatprep.subr.mxu0 %v889_v0 }
 0x354   :  { %396 = vadd.xlane.f32.xlu1 %v395_v43  ;;  %v547_v43 = vld [vmem:[#allocation7 + $0x20] sm:$0xff] }
 0x3d9   :  { %v393_v17 = vpop.xlane.xlu1 %392 }
 0x3da   :  { %v394_v19 = vmul.f32 0.03125, %v393_v17 }
 0x3dc   :  { %v399_v21 = vmul.f32 %v394_v19, %v394_v19  ;;  %v401_v26 = vsub.f32 %v1018_v41, %v394_v19  ;;  %v549_v41 = vld [vmem:[#allocation7 + $0x30] sm:$0xff] }
 0x3dd   :  { %v397_v20 = vpop.xlane.xlu1 %396  ;;  %754 = vmatpush3.msra.mxu0 %v549_v41 }
 0x3de   :  { %v398_v23 = vmul.f32 0.03125, %v397_v20  ;;  %755 = vmatprep.subr.mxu0 %v889_v0 }
 0x3df   :  { %756 = vmatpush3.msra.mxu0 %v548_v42 }
 0x3e0   :  { %v400_v24 = vsub.f32 %v398_v23, %v399_v21  ;;  %757 = vmatprep.subr.mxu0 %v889_v0 }
 0x3e1   :  { %758 = vmatpush3.msra.mxu0 %v547_v43 }
 0x3e2   :  { %v402_v25 = vadd.f32 1e-05, %v400_v24  ;;  %759 = vmatprep.subr.mxu0 %v889_v0 }
 0x3e3   :  { %760 = vmatpush3.msra.mxu0 %v546_v44 }
 0x3e4   :  { %788 = vrsqrt.f32 %v402_v25  ;;  %761 = vmatprep.subr.mxu0 %v889_v0 }
 0x3e5   :  { %762 = vmatpush3.msra.mxu0 %v545_v45 }
 0x3e6   :  { %763 = vmatprep.subr.mxu0 %v889_v0 }
 0x3e7   :  { %764 = vmatpush3.msra.mxu0 %v544_v46 }
 0x3e8   :  { %765 = vmatprep.subr.mxu0 %v889_v0 }
 0x3e9   :  { %766 = vmatpush3.msra.mxu0 %v543_v47 }
 0x3f1   :  { %v789_v28 = vpop.eup %788 }
 0x3f2   :  { %v404_v29 = vmul.f32 %v789_v28, %v401_v26 }
 0x3f4   :  { %v409_v31 = vmul.f32 %v408_v27, %v404_v29 }
 0x3f6   :  { %v414_v32 = vadd.f32 %v413_v30, %v409_v31 }
 0x3f8   :  { %v415_v33 = vmax.f32 %v414_v32, 0.0 }
 0x3fa   :  { %514 = vmatmul.mubr.f32.vlgmr.msra.gmra.mxu1 %v415_v33 }
 0x4ba   :  { %v515_v6 = vpop.f32.mrf.mxu1 }
 0x4bb   :  { %v524_v57 = vadd.f32 %v523_v54, %v515_v6 }
 0x4bc   :  { %v517_v49 = vpop.f32.mrf.mxu1 }
 0x4bd   :  { %v530_v50 = vadd.f32 %v529_v48, %v517_v49 }
 0x4bf   :  { %v531_v51 = vmax.f32 %v530_v50, 0.0 }
 0x4c1   :  { %v533_v55 = vadd.f32 0.1, %v531_v51 }
 0x4c3   :  { %v534_v56 = vadd.f32 1e-06, %v533_v55 }
 0x4c5   :  { %v535_v58 = vmax.f32 %v534_v56, 1e-05 }
 0x4c7   :  { %790 = vrcp.f32 %v535_v58 }
 0x4c8   :  { %792 = vtanh.f32 %v524_v57 }
 0x4d4   :  { %v791_v0 = vpop.eup %790 }
 0x4d5   :  { %v537_v59 = vmul.f32 %v791_v0, %v535_v58  ;;  %v793_v60 = vpop.eup %792 }
 0x4d6   :  { %v532_v62 = vadd.f32 0.1, %v793_v60 }
 0x4d7   :  { %v538_v61 = vsub.f32 2.0, %v537_v59 }
 0x4d9   :  { %v539_v18 = vmul.f32 %v791_v0, %v538_v61 }
 0x4db   :  { %v540_v63 = vmul.f32 %v539_v18, %v532_v62 }
 0x4dd   :  { %794 = vtanh.f32 %v540_v63 }
 0x4ea   :  { %v795_v1 = vpop.eup %794 }
 0x4eb   :  { %v542_v2 = vmax.f32 %v795_v1, 0.0 }
 0x4ed   :  { %768 = vmatmul.mubr.f32.vlgmr.msra.gmra.mxu0 %v542_v2 }
 0x5ad   :  { %v632_v22 = vpop.f32.mrf.mxu0 }
 0x5ae   :  { %v633_v7 = vadd.f32 %v655_v5, %v632_v22 }
 0x5af   :  { %v769_v3 = vpop.f32.mrf.mxu0 }
 0x5b0   :  { %636 = vst [vmem:[#allocation8] sm:$0xff] %v633_v7 }
 0x5b1   :  { %867 = shalt.err (!%p864_p5)
}
 0x5b2   :  { %646 = dma.vmem_to_hbm [thread:$0]  %s644_s27, 128, %s1064_s7, [#allocation4]  }
 0x5b3   :  { %880 = dma.done.wait [#allocation4], 128  }
 0x5b4   :  { %881 = vsyncadd [#allocation4], 4294967168 }
 0x5b5   :  { %650 = vsyncpa [#allocation3], 1 }
 0x5b6   :  { %651 = vsyncpa [#allocation6], 1 }
 0x5b7   :  { %652 = vsyncpa [#allocation4], 1 }

</bundles_post_ra>
